<compile_context>
chip_gen: v5e
topology: v5e:2x2
jax: 0.10.0
libtpu: 0.0.40
codegen_flags: <defaults>
</compile_context>

<pallas_src>
import jax
import jax.numpy as jnp
from jax.experimental import pallas as pl
from jax.experimental.pallas import tpu as pltpu

OUT_PAD = 128  # lane-dense padded output width (action_space sliced out after)
BT = 8         # graphs per grid step (keeps output block (8,128)-aligned)


# ----------------------------- Pallas kernel --------------------------------
def graph_nn_kernel(a_ref, x_ref, w1_ref, b1_ref, gamma_ref, beta_ref,
                    wl1_ref, bl1_ref, wl2_ref, bl2_ref, out_ref):
    # a_ref: (BT, N, N) bf16, x_ref: (BT, N, F_in) bf16 -- a tile of BT graphs.
    # GCNConv, re-associated: h = (A_hat @ X) @ W + b, f32 accumulate.
    ax = jnp.einsum("bij,bjf->bif", a_ref[...], x_ref[...],
                    preferred_element_type=jnp.float32)              # (BT, N, F_in)
    h = jnp.einsum("bnf,fh->bnh", ax, w1_ref[...],
                   preferred_element_type=jnp.float32) + b1_ref[...]  # (BT, N, H1)
    # ReLU
    h = jnp.maximum(h, 0.0)
    # LayerNorm over the feature axis (per node), eps = 1e-5, biased variance
    mu = jnp.mean(h, axis=-1, keepdims=True)
    var = jnp.mean((h - mu) * (h - mu), axis=-1, keepdims=True)
    hn = (h - mu) * jax.lax.rsqrt(var + 1e-5)
    hn = hn * gamma_ref[...] + beta_ref[...]
    # global_mean_pool: all nodes of each graph belong to one batch id.
    # TODO(synk): if N is ever padded for row tiling, mask and divide by the
    # true node count instead of the block row count.
    p = jnp.mean(hn, axis=1)                                          # (BT, H1)
    # linear1 + ReLU
    z = jnp.dot(p, wl1_ref[...], preferred_element_type=jnp.float32) + bl1_ref[...]
    z = jnp.maximum(z, 0.0)                                           # (BT, H2)
    # linear2 (padded to 128 lanes -> unmasked full-lane store)
    out_ref[...] = (jnp.dot(z, wl2_ref[...], preferred_element_type=jnp.float32)
                    + bl2_ref[...])                                   # (BT, OUT_PAD)


# ------------------------------- JAX glue ------------------------------------
def gcn_norm_dense(edge_index, edge_weight, num_nodes):
    """Dense symmetric-normalized adjacency with self loops (GCNConv norm)."""
    row = edge_index[0]
    col = edge_index[1]
    loop = jnp.arange(num_nodes, dtype=row.dtype)
    row = jnp.concatenate([row, loop])
    col = jnp.concatenate([col, loop])
    ew = jnp.concatenate([edge_weight,
                          jnp.ones((num_nodes,), dtype=edge_weight.dtype)])
    deg = jnp.zeros((num_nodes,), dtype=ew.dtype).at[col].add(ew)
    dinv = jnp.where(deg > 0, 1.0 / jnp.sqrt(deg), 0.0)
    norm = dinv[row] * ew * dinv[col]
    # aggregation: out[target] += norm * h[source]  (source=row, target=col)
    a_hat = jnp.zeros((num_nodes, num_nodes), dtype=ew.dtype).at[col, row].add(norm)
    return a_hat


def graph_nn_forward(x, edge_index, edge_weight, params):
    """x: (B, N, F_in) node features, edge_weight: (B, E); shared edge_index."""
    B, N, F_in = x.shape
    H1 = params["w1"].shape[1]
    H2 = params["wl1"].shape[1]
    action_space = params["wl2"].shape[1]

    # Dense normalized adjacency per graph (JAX scatter glue).
    a_hat = jax.vmap(lambda ew: gcn_norm_dense(edge_index, ew, N))(edge_weight)

    # TODO(synk): the PyTorch code builds a batch vector of length E+1 for
    # global_mean_pool; semantically all nodes map to graph 0, so we pool over
    # all N nodes of each graph (the E+1 length is a quirk of the original code).

    # bf16 only for the MXU operands of the big A matmul (A_hat entries ~[0,1]).
    a_bf16 = a_hat.astype(jnp.bfloat16)
    x_bf16 = x.astype(jnp.bfloat16)

    # Pad batch to a multiple of BT so the (BT, 128) output block is aligned.
    B_pad = ((B + BT - 1) // BT) * BT
    if B_pad != B:
        pad = B_pad - B
        a_bf16 = jnp.pad(a_bf16, ((0, pad), (0, 0), (0, 0)))
        x_bf16 = jnp.pad(x_bf16, ((0, pad), (0, 0), (0, 0)))

    # Lane-dense output: pad linear2 to OUT_PAD columns with zeros.
    wl2p = jnp.zeros((H2, OUT_PAD), jnp.float32).at[:, :action_space].set(params["wl2"])
    bl2p = jnp.zeros((1, OUT_PAD), jnp.float32).at[:, :action_space].set(params["bl2"])

    # Advisory cost estimate (helps XLA schedule the scatter/transfers around us).
    flops_per_graph = (2 * N * N * F_in + 2 * N * F_in * H1 + 12 * N * H1
                       + 2 * H1 * H2 + 2 * H2 * OUT_PAD)
    weight_bytes = 4 * (F_in * H1 + 3 * H1 + H1 * H2 + H2 + H2 * OUT_PAD + OUT_PAD)
    bytes_per_graph = 2 * N * N + 2 * N * F_in + 4 * OUT_PAD
    ce = pl.CostEstimate(flops=B_pad * flops_per_graph,
                         transcendentals=B_pad * N,
                         bytes_accessed=B_pad * bytes_per_graph + weight_bytes)

    batch_spec = lambda shape: pl.BlockSpec((BT,) + shape, lambda b: (b, 0, 0))
    const_spec = lambda shape: pl.BlockSpec(shape, lambda b: (0, 0))

    out = pl.pallas_call(
        graph_nn_kernel,
        out_shape=jax.ShapeDtypeStruct((B_pad, OUT_PAD), jnp.float32),
        grid=(B_pad // BT,),
        in_specs=[
            batch_spec((N, N)),          # A_hat  (per-graph tile)
            batch_spec((N, F_in)),       # X      (per-graph tile)
            const_spec((F_in, H1)),      # w1
            const_spec((1, H1)),         # b1
            const_spec((1, H1)),         # gamma
            const_spec((1, H1)),         # beta
            const_spec((H1, H2)),        # wl1
            const_spec((1, H2)),         # bl1
            const_spec((H2, OUT_PAD)),   # wl2 (padded)
            const_spec((1, OUT_PAD)),    # bl2 (padded)
        ],
        out_specs=pl.BlockSpec((BT, OUT_PAD), lambda b: (b, 0)),
        compiler_params=pltpu.CompilerParams(dimension_semantics=("parallel",)),
        cost_estimate=ce,
    )(a_bf16, x_bf16,
      params["w1"], params["b1"],
      params["gamma"], params["beta"],
      params["wl1"], params["bl1"],
      wl2p, bl2p)

    return out[:B, :action_space]


def reference_forward(x, edge_index, edge_weight, params):
    """Pure-JAX f32 reference of the PyTorch forward, for a batch of graphs."""
    def one(xg, ewg):
        a = gcn_norm_dense(edge_index, ewg, xg.shape[0])
        h = a @ (xg @ params["w1"]) + params["b1"]
        h = jnp.maximum(h, 0.0)
        mu = h.mean(-1, keepdims=True)
        var = ((h - mu) ** 2).mean(-1, keepdims=True)
        hn = (h - mu) / jnp.sqrt(var + 1e-5) * params["gamma"] + params["beta"]
        p = hn.mean(0, keepdims=True)
        z = jnp.maximum(p @ params["wl1"] + params["bl1"], 0.0)
        return (z @ params["wl2"] + params["bl2"])[0]
    return jax.vmap(one)(x, edge_weight)


def init_params(key, input_dim=2, hidden_dim1=64, hidden_dim2=16, action_space=4):
    ks = jax.random.split(key, 6)
    scale = 0.1
    return {
        "w1":    scale * jax.random.normal(ks[0], (input_dim, hidden_dim1), jnp.float32),
        "b1":    scale * jax.random.normal(ks[1], (1, hidden_dim1), jnp.float32),
        "gamma": jnp.ones((1, hidden_dim1), jnp.float32),
        "beta":  jnp.zeros((1, hidden_dim1), jnp.float32),
        "wl1":   scale * jax.random.normal(ks[2], (hidden_dim1, hidden_dim2), jnp.float32),
        "bl1":   scale * jax.random.normal(ks[3], (1, hidden_dim2), jnp.float32),
        "wl2":   scale * jax.random.normal(ks[4], (hidden_dim2, action_space), jnp.float32),
        "bl2":   scale * jax.random.normal(ks[5], (1, action_space), jnp.float32),
    }


if __name__ == "__main__":
    key = jax.random.PRNGKey(0)
    k_x, k_w, k_ew = jax.random.split(key, 3)

    batch = 4
    num_nodes = 8
    input_dim = 2
    hidden_dim1 = 64
    hidden_dim2 = 16
    action_space = 4

    # Node features (B, N, input_dim)
    x = jax.random.normal(k_x, (batch, num_nodes, input_dim), jnp.float32)

    # Small deterministic ring graph: i -> (i+1) mod N, plus reverse edges (shared topology)
    src = jnp.arange(num_nodes, dtype=jnp.int32)
    dst = (src + 1) % num_nodes
    edge_index = jnp.stack([jnp.concatenate([src, dst]),
                            jnp.concatenate([dst, src])], axis=0)   # (2, 2N)
    edge_weight = jax.random.uniform(k_ew, (batch, edge_index.shape[1]),
                                     jnp.float32, minval=0.5, maxval=1.5)

    params = init_params(k_w, input_dim, hidden_dim1, hidden_dim2, action_space)

    out = graph_nn_forward(x, edge_index, edge_weight, params)
    out = jax.block_until_ready(out)
    assert out.shape == (batch, action_space)

    ref = reference_forward(x, edge_index, edge_weight, params)
    assert jnp.allclose(out, ref, atol=5e-2, rtol=5e-2), "mismatch vs f32 reference"

    print("KERNEL_OK")
</pallas_src>

<mosaic_0001>
module attributes {stable_mosaic.version = 11 : i64} {
  func.func @graph_nn_kernel(%arg0: i32, %arg1: memref<8x8x8xbf16, #tpu.memory_space<vmem>>, %arg2: memref<8x8x2xbf16, #tpu.memory_space<vmem>>, %arg3: memref<2x64xf32, #tpu.memory_space<vmem>>, %arg4: memref<1x64xf32, #tpu.memory_space<vmem>>, %arg5: memref<1x64xf32, #tpu.memory_space<vmem>>, %arg6: memref<1x64xf32, #tpu.memory_space<vmem>>, %arg7: memref<64x16xf32, #tpu.memory_space<vmem>>, %arg8: memref<1x16xf32, #tpu.memory_space<vmem>>, %arg9: memref<16x128xf32, #tpu.memory_space<vmem>>, %arg10: memref<1x128xf32, #tpu.memory_space<vmem>>, %arg11: memref<8x128xf32, #tpu.memory_space<vmem>>) attributes {dimension_semantics = [#tpu.dimension_semantics<parallel>], iteration_bounds = array<i64: 1>, scalar_prefetch = 0 : i64, scratch_operands = 0 : i64, tpu.core_type = #tpu.core_type<tc>, window_params = [{transform_indices = @transform_0, window_bounds = array<i64: 8, 8, 8>}, {transform_indices = @transform_1, window_bounds = array<i64: 8, 8, 2>}, {pipeline_mode = #tpu.pipeline_mode<synchronous>, transform_indices = @transform_2, window_bounds = array<i64: 2, 64>}, {pipeline_mode = #tpu.pipeline_mode<synchronous>, transform_indices = @transform_3, window_bounds = array<i64: 1, 64>}, {pipeline_mode = #tpu.pipeline_mode<synchronous>, transform_indices = @transform_4, window_bounds = array<i64: 1, 64>}, {pipeline_mode = #tpu.pipeline_mode<synchronous>, transform_indices = @transform_5, window_bounds = array<i64: 1, 64>}, {pipeline_mode = #tpu.pipeline_mode<synchronous>, transform_indices = @transform_6, window_bounds = array<i64: 64, 16>}, {pipeline_mode = #tpu.pipeline_mode<synchronous>, transform_indices = @transform_7, window_bounds = array<i64: 1, 16>}, {pipeline_mode = #tpu.pipeline_mode<synchronous>, transform_indices = @transform_8, window_bounds = array<i64: 16, 128>}, {pipeline_mode = #tpu.pipeline_mode<synchronous>, transform_indices = @transform_9, window_bounds = array<i64: 1, 128>}, {transform_indices = @transform_10, window_bounds = array<i64: 8, 128>}]} {
    %c0 = arith.constant 0 : index
    %c0_0 = arith.constant 0 : index
    %c0_1 = arith.constant 0 : index
    %0 = vector.load %arg1[%c0, %c0_0, %c0_1] : memref<8x8x8xbf16, #tpu.memory_space<vmem>>, vector<8x8x8xbf16>
    %c0_2 = arith.constant 0 : index
    %c0_3 = arith.constant 0 : index
    %c0_4 = arith.constant 0 : index
    %1 = vector.load %arg2[%c0_2, %c0_3, %c0_4] : memref<8x8x2xbf16, #tpu.memory_space<vmem>>, vector<8x8x2xbf16>
    "tpu.trace_start"() <{level = 10 : i32, message = "bij,bjf->bif"}> : () -> ()
    %cst = arith.constant dense<0.000000e+00> : vector<8x8x2xf32>
    %2 = tpu.matmul %0, %1, %cst {dimension_numbers = #tpu.dot_dimension_numbers<[2], [1], [1], [2], [0, 0, 0, 1, 1, 2], [0], [0]>} : vector<8x8x8xbf16>, vector<8x8x2xbf16>, vector<8x8x2xf32> -> vector<8x8x2xf32>
    "tpu.trace_stop"() : () -> ()
    %c0_5 = arith.constant 0 : index
    %c0_6 = arith.constant 0 : index
    %3 = vector.load %arg3[%c0_5, %c0_6] : memref<2x64xf32, #tpu.memory_space<vmem>>, vector<2x64xf32>
    "tpu.trace_start"() <{level = 10 : i32, message = "bnf,fh->bnh"}> : () -> ()
    %cst_7 = arith.constant dense<0.000000e+00> : vector<8x8x64xf32>
    %4 = tpu.matmul %2, %3, %cst_7 {dimension_numbers = #tpu.dot_dimension_numbers<[2], [0], [0, 1], [1], [0, 0, 0, 1, 1, 1], [], []>} : vector<8x8x2xf32>, vector<2x64xf32>, vector<8x8x64xf32> -> vector<8x8x64xf32>
    "tpu.trace_stop"() : () -> ()
    %c0_8 = arith.constant 0 : index
    %c0_9 = arith.constant 0 : index
    %5 = vector.load %arg4[%c0_8, %c0_9] : memref<1x64xf32, #tpu.memory_space<vmem>>, vector<1x64xf32>
    %6 = vector.shape_cast %5 : vector<1x64xf32> to vector<1x1x64xf32>
    %7 = vector.broadcast %6 : vector<1x1x64xf32> to vector<8x8x64xf32>
    %8 = arith.addf %4, %7 : vector<8x8x64xf32>
    %cst_10 = arith.constant 0.000000e+00 : f32
    %9 = vector.broadcast %cst_10 : f32 to vector<8x8x64xf32>
    %10 = arith.maximumf %8, %9 : vector<8x8x64xf32>
    %cst_11 = arith.constant dense<0.000000e+00> : vector<8x8xf32>
    %11 = vector.multi_reduction <add>, %10, %cst_11 [2] : vector<8x8x64xf32> to vector<8x8xf32>
    %12 = vector.shape_cast %11 : vector<8x8xf32> to vector<8x8x1xf32>
    %cst_12 = arith.constant 6.400000e+01 : f32
    %13 = vector.broadcast %cst_12 : f32 to vector<8x8x1xf32>
    %14 = arith.divf %12, %13 : vector<8x8x1xf32>
    %15 = vector.broadcast %14 : vector<8x8x1xf32> to vector<8x8x64xf32>
    %16 = arith.subf %10, %15 : vector<8x8x64xf32>
    %17 = vector.broadcast %14 : vector<8x8x1xf32> to vector<8x8x64xf32>
    %18 = arith.subf %10, %17 : vector<8x8x64xf32>
    %19 = arith.mulf %16, %18 : vector<8x8x64xf32>
    %cst_13 = arith.constant dense<0.000000e+00> : vector<8x8xf32>
    %20 = vector.multi_reduction <add>, %19, %cst_13 [2] : vector<8x8x64xf32> to vector<8x8xf32>
    %21 = vector.shape_cast %20 : vector<8x8xf32> to vector<8x8x1xf32>
    %cst_14 = arith.constant 6.400000e+01 : f32
    %22 = vector.broadcast %cst_14 : f32 to vector<8x8x1xf32>
    %23 = arith.divf %21, %22 : vector<8x8x1xf32>
    %24 = vector.broadcast %14 : vector<8x8x1xf32> to vector<8x8x64xf32>
    %25 = arith.subf %10, %24 : vector<8x8x64xf32>
    %cst_15 = arith.constant 9.99999974E-6 : f32
    %26 = vector.broadcast %cst_15 : f32 to vector<8x8x1xf32>
    %27 = arith.addf %23, %26 : vector<8x8x1xf32>
    %28 = math.rsqrt %27 : vector<8x8x1xf32>
    %29 = vector.broadcast %28 : vector<8x8x1xf32> to vector<8x8x64xf32>
    %30 = arith.mulf %25, %29 : vector<8x8x64xf32>
    %c0_16 = arith.constant 0 : index
    %c0_17 = arith.constant 0 : index
    %31 = vector.load %arg5[%c0_16, %c0_17] : memref<1x64xf32, #tpu.memory_space<vmem>>, vector<1x64xf32>
    %32 = vector.shape_cast %31 : vector<1x64xf32> to vector<1x1x64xf32>
    %33 = vector.broadcast %32 : vector<1x1x64xf32> to vector<8x8x64xf32>
    %34 = arith.mulf %30, %33 : vector<8x8x64xf32>
    %c0_18 = arith.constant 0 : index
    %c0_19 = arith.constant 0 : index
    %35 = vector.load %arg6[%c0_18, %c0_19] : memref<1x64xf32, #tpu.memory_space<vmem>>, vector<1x64xf32>
    %36 = vector.shape_cast %35 : vector<1x64xf32> to vector<1x1x64xf32>
    %37 = vector.broadcast %36 : vector<1x1x64xf32> to vector<8x8x64xf32>
    %38 = arith.addf %34, %37 : vector<8x8x64xf32>
    %cst_20 = arith.constant dense<0.000000e+00> : vector<8x64xf32>
    %39 = vector.multi_reduction <add>, %38, %cst_20 [1] : vector<8x8x64xf32> to vector<8x64xf32>
    %cst_21 = arith.constant 8.000000e+00 : f32
    %40 = vector.broadcast %cst_21 : f32 to vector<8x64xf32>
    %41 = arith.divf %39, %40 : vector<8x64xf32>
    %c0_22 = arith.constant 0 : index
    %c0_23 = arith.constant 0 : index
    %42 = vector.load %arg7[%c0_22, %c0_23] : memref<64x16xf32, #tpu.memory_space<vmem>>, vector<64x16xf32>
    %cst_24 = arith.constant dense<0.000000e+00> : vector<8x16xf32>
    %43 = tpu.matmul %41, %42, %cst_24 {dimension_numbers = #tpu.dot_dimension_numbers<[1], [0], [0], [1], [0, 0, 1, 1], [], []>} : vector<8x64xf32>, vector<64x16xf32>, vector<8x16xf32> -> vector<8x16xf32>
    %c0_25 = arith.constant 0 : index
    %c0_26 = arith.constant 0 : index
    %44 = vector.load %arg8[%c0_25, %c0_26] : memref<1x16xf32, #tpu.memory_space<vmem>>, vector<1x16xf32>
    %45 = vector.broadcast %44 : vector<1x16xf32> to vector<8x16xf32>
    %46 = arith.addf %43, %45 : vector<8x16xf32>
    %cst_27 = arith.constant 0.000000e+00 : f32
    %47 = vector.broadcast %cst_27 : f32 to vector<8x16xf32>
    %48 = arith.maximumf %46, %47 : vector<8x16xf32>
    %c0_28 = arith.constant 0 : index
    %c0_29 = arith.constant 0 : index
    %49 = vector.load %arg9[%c0_28, %c0_29] : memref<16x128xf32, #tpu.memory_space<vmem>>, vector<16x128xf32>
    %cst_30 = arith.constant dense<0.000000e+00> : vector<8x128xf32>
    %50 = tpu.matmul %48, %49, %cst_30 {dimension_numbers = #tpu.dot_dimension_numbers<[1], [0], [0], [1], [0, 0, 1, 1], [], []>} : vector<8x16xf32>, vector<16x128xf32>, vector<8x128xf32> -> vector<8x128xf32>
    %c0_31 = arith.constant 0 : index
    %c0_32 = arith.constant 0 : index
    %51 = vector.load %arg10[%c0_31, %c0_32] : memref<1x128xf32, #tpu.memory_space<vmem>>, vector<1x128xf32>
    %52 = vector.broadcast %51 : vector<1x128xf32> to vector<8x128xf32>
    %53 = arith.addf %50, %52 : vector<8x128xf32>
    %c0_33 = arith.constant 0 : index
    %c0_34 = arith.constant 0 : index
    %54 = vector.load %arg11[%c0_33, %c0_34] : memref<8x128xf32, #tpu.memory_space<vmem>>, vector<8x128xf32>
    tpu.vector_store %arg11[%c0_33, %c0_34], %53 {strides = array<i32>} : memref<8x128xf32, #tpu.memory_space<vmem>>, vector<8x128xf32>,
    return
  }
  func.func @transform_0(%arg0: i32) -> (i32, i32, i32) {
    %c0_i32 = arith.constant 0 : i32
    %c0_i32_0 = arith.constant 0 : i32
    %c0_i32_1 = arith.constant 0 : i32
    return %arg0, %c0_i32, %c0_i32_0 : i32, i32, i32
  }
  func.func @transform_1(%arg0: i32) -> (i32, i32, i32) {
    %c0_i32 = arith.constant 0 : i32
    %c0_i32_0 = arith.constant 0 : i32
    %c0_i32_1 = arith.constant 0 : i32
    return %arg0, %c0_i32, %c0_i32_0 : i32, i32, i32
  }
  func.func @transform_2(%arg0: i32) -> (i32, i32) {
    %c0_i32 = arith.constant 0 : i32
    %c0_i32_0 = arith.constant 0 : i32
    %c0_i32_1 = arith.constant 0 : i32
    return %c0_i32, %c0_i32_0 : i32, i32
  }
  func.func @transform_3(%arg0: i32) -> (i32, i32) {
    %c0_i32 = arith.constant 0 : i32
    %c0_i32_0 = arith.constant 0 : i32
    %c0_i32_1 = arith.constant 0 : i32
    return %c0_i32, %c0_i32_0 : i32, i32
  }
  func.func @transform_4(%arg0: i32) -> (i32, i32) {
    %c0_i32 = arith.constant 0 : i32
    %c0_i32_0 = arith.constant 0 : i32
    %c0_i32_1 = arith.constant 0 : i32
    return %c0_i32, %c0_i32_0 : i32, i32
  }
  func.func @transform_5(%arg0: i32) -> (i32, i32) {
    %c0_i32 = arith.constant 0 : i32
    %c0_i32_0 = arith.constant 0 : i32
    %c0_i32_1 = arith.constant 0 : i32
    return %c0_i32, %c0_i32_0 : i32, i32
  }
  func.func @transform_6(%arg0: i32) -> (i32, i32) {
    %c0_i32 = arith.constant 0 : i32
    %c0_i32_0 = arith.constant 0 : i32
    %c0_i32_1 = arith.constant 0 : i32
    return %c0_i32, %c0_i32_0 : i32, i32
  }
  func.func @transform_7(%arg0: i32) -> (i32, i32) {
    %c0_i32 = arith.constant 0 : i32
    %c0_i32_0 = arith.constant 0 : i32
    %c0_i32_1 = arith.constant 0 : i32
    return %c0_i32, %c0_i32_0 : i32, i32
  }
  func.func @transform_8(%arg0: i32) -> (i32, i32) {
    %c0_i32 = arith.constant 0 : i32
    %c0_i32_0 = arith.constant 0 : i32
    %c0_i32_1 = arith.constant 0 : i32
    return %c0_i32, %c0_i32_0 : i32, i32
  }
  func.func @transform_9(%arg0: i32) -> (i32, i32) {
    %c0_i32 = arith.constant 0 : i32
    %c0_i32_0 = arith.constant 0 : i32
    %c0_i32_1 = arith.constant 0 : i32
    return %c0_i32, %c0_i32_0 : i32, i32
  }
  func.func @transform_10(%arg0: i32) -> (i32, i32) {
    %c0_i32 = arith.constant 0 : i32
    %c0_i32_0 = arith.constant 0 : i32
    return %arg0, %c0_i32 : i32, i32
  }
}

</mosaic_0001>

<bundles_post_ra>
// kernel: tpu_custom_call.1
= control target key start
LH: loop header
LB: loop body
LE: loop exit
PB: predicated region body
PF: predicated region fallthrough
CT: control target
= control target key end

     0   :  { %vm57_vm0 = vcmask 1043456   ;;  %vm53_vm1 = vcmask 64512   ;;  %s1072_s0 = inlined_call_operand.vmem [shape: bf16[8,8,8], index: 0, kind: input, shape index: {}]   ;;  %s1073_s1 = inlined_call_operand.vmem [shape: bf16[8,8,2], index: 1, kind: input, shape index: {}]   ;;  %s1074_s2 = inlined_call_operand.vmem [shape: f32[2,64], index: 2, kind: input, shape index: {}]   ;;  %s1075_s3 = inlined_call_operand.vmem [shape: f32[1,64], index: 3, kind: input, shape index: {}]   ;;  %s1076_s4 = inlined_call_operand.vmem [shape: f32[1,64], index: 4, kind: input, shape index: {}]   ;;  %s1077_s5 = inlined_call_operand.vmem [shape: f32[1,64], index: 5, kind: input, shape index: {}]   ;;  %s1078_s6 = inlined_call_operand.vmem [shape: f32[64,16], index: 6, kind: input, shape index: {}]   ;;  %s1079_s7 = inlined_call_operand.vmem [shape: f32[1,16], index: 7, kind: input, shape index: {}]   ;;  %s1080_s8 = inlined_call_operand.vmem [shape: f32[16,128], index: 8, kind: input, shape index: {}]   ;;  %s1081_s9 = inlined_call_operand.vmem [shape: f32[1,128], index: 9, kind: input, shape index: {}]   ;;  %s1082_s10 = inlined_call_operand.hbm [shape: f32[8,128], index: 10, kind: output, shape index: {}]  }
   0x1   :  { %v45_v0 = vld [vmem:[%s1073_s1] sm:$0xf]  ;;  %v46_v1 = vld [vmem:[%s1073_s1 + $0x4] sm:$0xf]  ;;  %v48_v6 = vld [vmem:[%s1073_s1 + $0xc] sm:$0xf] }
   0x2   :  { %v59_v2 = vsel %vm57_vm0, %v45_v0, 0  ;;  %v78_v3 = vsel %vm57_vm0, %v46_v1, 0  ;;  %v37_v4 = vld [vmem:[%s1072_s0] sm:$0xf]  ;;  %v38_v5 = vld [vmem:[%s1072_s0 + $0x4] sm:$0xf] }
   0x3   :  { %68 = vmatpush.bf16.msra.mxu0 %v59_v2  ;;  %87 = vmatpush.bf16.msra.mxu1 %v78_v3  ;;  %v47_v7 = vld [vmem:[%s1073_s1 + $0x8] sm:$0xf]  ;;  %v49_v8 = vld [vmem:[%s1073_s1 + $0x10] sm:$0xf]  ;;  %v116_v9 = vsel %vm57_vm0, %v48_v6, 0 }
   0x4   :  { %v97_v10 = vsel %vm57_vm0, %v47_v7, 0  ;;  %v135_v11 = vsel %vm57_vm0, %v49_v8, 0  ;;  %v39_v12 = vld [vmem:[%s1072_s0 + $0x8] sm:$0xf]  ;;  %v50_v13 = vld [vmem:[%s1073_s1 + $0x14] sm:$0xf] }
   0x5   :  { %106 = vmatpush.bf16.msra.mxu2 %v97_v10  ;;  %v154_v14 = vsel %vm57_vm0, %v50_v13, 0  ;;  %v51_v15 = vld [vmem:[%s1073_s1 + $0x18] sm:$0xf]  ;;  %v52_v17 = vld [vmem:[%s1073_s1 + $0x1c] sm:$0xf] }
   0x6   :  { %673 = vmatmul.msk.bf16.vlgmr.msra.gmra.mxu0 %vm53_vm1, %v37_v4  ;;  %674 = vmatmul.msk.bf16.vlgmr.msra.gmra.mxu1 %vm53_vm1, %v38_v5  ;;  %v173_v16 = vsel %vm57_vm0, %v51_v15, 0  ;;  %v192_v18 = vsel %vm57_vm0, %v52_v17, 0  ;;  %v44_v19 = vld [vmem:[%s1072_s0 + $0x1c] sm:$0xf] }
   0x7   :  { %125 = vmatpush.bf16.msrb.mxu1 %v116_v9  ;;  %144 = vmatpush.bf16.msrb.mxu0 %v135_v11 }
   0x8   :  { %675 = vmatmul.msk.bf16.vlgmr.msra.gmra.mxu2 %vm53_vm1, %v39_v12  ;;  %201 = vmatpush.bf16.msra.mxu3 %v192_v18 }
   0x9   :  { %182 = vmatpush.bf16.msrb.mxu2 %v173_v16 }
   0xb   :  { %163 = vmatpush.bf16.msra.mxu1 %v154_v14 }
   0xc   :  { %15 = vsyncpa [#allocation3], 0  ;;  %680 = vmatmul.msk.bf16.vlgmr.msra.gmra.mxu3 %vm53_vm1, %v44_v19  ;;  %v40_v20 = vld [vmem:[%s1072_s0 + $0xc] sm:$0xf]  ;;  %v41_v21 = vld [vmem:[%s1072_s0 + $0x10] sm:$0xf] }
   0xd   :  { %v43_v22 = vld [vmem:[%s1072_s0 + $0x18] sm:$0xf]  ;;  %v42_v23 = vld [vmem:[%s1072_s0 + $0x14] sm:$0xf]  ;;  %v207_v24 = vld [vmem:[%s1074_s2] sm:$0x3] }
   0xe   :  { %vm237_vm2 = vcmask 1041408   ;;  %vm212_vm3 = vcmask 15360   ;;  %v696_v41 = vld [vmem:[%s1075_s3] ss:$0 sm:$0xff]  ;;  %vm290_vm4 = vcmask 523264   ;;  %v747_v10 = vmov 64.0  }
   0xf   :  { %681 = vmatpush.msk.msra.mxu0 %vm237_vm2, %v207_v24  ;;  %692 = vmatpush.msk.msrb.mxu3 %vm237_vm2, %v207_v24  ;;  %701 = vrcp.f32 %v747_v10  ;;  %s749_s3 = smov [#allocation2]   ;;  %s664_s28 = sshll.u32 %s1082_s10, 4  ;;  %s665_s28 = int_to_ptr.hbm [resolvable:$true] %s664_s28 }
  0x10   :  { %s662_s26 = sshll.u32 %s749_s3, 4  ;;  %s663_s26 = int_to_ptr.vmem [resolvable:$true] %s662_s26 }
  0x15   :  { %v702_v11 = vpop.eup %701 }
  0x16   :  { %676 = vmatmul.msk.bf16.vlgmr.msrb.gmra.mxu1 %vm53_vm1, %v40_v20  ;;  %677 = vmatmul.msk.bf16.vlgmr.msrb.gmra.mxu0 %vm53_vm1, %v41_v21  ;;  %v316_v12 = vmul.f32 64.0, %v702_v11  ;;  %vm320_vm5 = vweird.f32 %v702_v11 }
  0x18   :  { %679 = vmatmul.msk.bf16.vlgmr.msrb.gmra.mxu2 %vm53_vm1, %v43_v22  ;;  %v317_v13 = vsub.f32 1.0, %v316_v12 }
  0x1a   :  { %v318_v14 = vmul.f32 %v702_v11, %v317_v13 }
  0x1c   :  { %v319_v15 = vadd.f32 %v702_v11, %v318_v14 }
  0x1e   :  { %v891_v16 = vsel %vm320_vm5, %v702_v11, %v319_v15 }
  0x26   :  { %678 = vmatmul.msk.bf16.vlgmr.msra.gmra.mxu1 %vm53_vm1, %v42_v23 }
  0x83   :  { %v70_v25 = vpop.f32.mrf.mxu0  ;;  %v89_v26 = vpop.f32.mrf.mxu1 }
  0x84   :  { %682 = vmatmul.msk.f32.vlgmr.msra.gmra.mxu0 %vm212_vm3, %v70_v25 }
  0x8b   :  { %v72_v27 = vpop.f32.mrf.mxu0  ;;  %v91_v28 = vpop.f32.mrf.mxu1 }
  0x8c   :  { %683 = vmatmul.msk.f32.gmra.mxu0 %vm212_vm3, %v89_v26  ;;  %v108_v29 = vpop.f32.mrf.mxu2 }
  0x8f   :  { %v203_v30 = vpop.f32.mrf.mxu3 }
  0x93   :  { %v127_v31 = vpop.f32.mrf.mxu1  ;;  %v146_v32 = vpop.f32.mrf.mxu0 }
  0x94   :  { %684 = vmatmul.msk.f32.gmra.mxu0 %vm212_vm3, %v108_v29  ;;  %685 = vmatmul.msk.f32.vlgmr.msrb.gmra.mxu3 %vm212_vm3, %v127_v31  ;;  %v110_v33 = vpop.f32.mrf.mxu2 }
  0x97   :  { %v205_v34 = vpop.f32.mrf.mxu3 }
  0x9b   :  { %v129_v35 = vpop.f32.mrf.mxu1  ;;  %v148_v36 = vpop.f32.mrf.mxu0 }
  0x9c   :  { %686 = vmatmul.msk.f32.gmra.mxu3 %vm212_vm3, %v146_v32  ;;  %v184_v37 = vpop.f32.mrf.mxu2 }
  0xa3   :  { %v165_v38 = vpop.f32.mrf.mxu1 }
  0xa4   :  { %687 = vmatmul.msk.f32.gmra.mxu3 %vm212_vm3, %v165_v38  ;;  %v186_v39 = vpop.f32.mrf.mxu2 }
  0xab   :  { %v167_v40 = vpop.f32.mrf.mxu1 }
  0xac   :  { %688 = vmatmul.msk.f32.gmra.mxu3 %vm212_vm3, %v184_v37 }
  0xb4   :  { %689 = vmatmul.msk.f32.gmra.mxu3 %vm212_vm3, %v203_v30 }
 0x101   :  { %v258_v42 = vpop.f32.mrf.mxu0 }
 0x102   :  { %v259_v43 = vadd.f32 %v696_v41, %v258_v42 }
 0x104   :  { %v282_v44 = vmax.f32 %v259_v43, 0.0 }
 0x106   :  { %v291_v45 = vsel %vm290_vm4, %v282_v44, 0.0 }
 0x107   :  { %292 = vadd.xlane.f32.xlu0 %v291_v45 }
 0x109   :  { %v261_v46 = vpop.f32.mrf.mxu0 }
 0x10a   :  { %v262_v47 = vadd.f32 %v696_v41, %v261_v46 }
 0x10c   :  { %v283_v48 = vmax.f32 %v262_v47, 0.0 }
 0x10e   :  { %v294_v49 = vsel %vm290_vm4, %v283_v48, 0.0 }
 0x10f   :  { %295 = vadd.xlane.f32.xlu0 %v294_v49 }
 0x111   :  { %v264_v50 = vpop.f32.mrf.mxu0 }
 0x112   :  { %v265_v51 = vadd.f32 %v696_v41, %v264_v50 }
 0x114   :  { %v284_v52 = vmax.f32 %v265_v51, 0.0 }
 0x116   :  { %v297_v53 = vsel %vm290_vm4, %v284_v52, 0.0 }
 0x117   :  { %v267_v54 = vpop.f32.mrf.mxu3  ;;  %298 = vadd.xlane.f32.xlu1 %v297_v53 }
 0x118   :  { %v268_v55 = vadd.f32 %v696_v41, %v267_v54 }
 0x11a   :  { %v285_v56 = vmax.f32 %v268_v55, 0.0 }
 0x11c   :  { %v300_v57 = vsel %vm290_vm4, %v285_v56, 0.0 }
 0x11f   :  { %v270_v58 = vpop.f32.mrf.mxu3  ;;  %301 = vadd.xlane.f32.xlu1 %v300_v57 }
 0x120   :  { %v271_v59 = vadd.f32 %v696_v41, %v270_v58 }
 0x122   :  { %v286_v60 = vmax.f32 %v271_v59, 0.0 }
 0x124   :  { %v303_v61 = vsel %vm290_vm4, %v286_v60, 0.0 }
 0x125   :  { %304 = vadd.xlane.f32.xlu2 %v303_v61 }
 0x127   :  { %v273_v62 = vpop.f32.mrf.mxu3 }
 0x128   :  { %v274_v63 = vadd.f32 %v696_v41, %v273_v62 }
 0x12a   :  { %v287_v0 = vmax.f32 %v274_v63, 0.0 }
 0x12c   :  { %v306_v1 = vsel %vm290_vm4, %v287_v0, 0.0 }
 0x12d   :  { %307 = vadd.xlane.f32.xlu2 %v306_v1 }
 0x12f   :  { %v276_v2 = vpop.f32.mrf.mxu3 }
 0x130   :  { %v277_v3 = vadd.f32 %v696_v41, %v276_v2 }
 0x132   :  { %v288_v4 = vmax.f32 %v277_v3, 0.0 }
 0x134   :  { %v309_v5 = vsel %vm290_vm4, %v288_v4, 0.0 }
 0x135   :  { %310 = vadd.xlane.f32.xlu0 %v309_v5 }
 0x137   :  { %v279_v6 = vpop.f32.mrf.mxu3 }
 0x138   :  { %v280_v7 = vadd.f32 %v696_v41, %v279_v6 }
 0x13a   :  { %v289_v8 = vmax.f32 %v280_v7, 0.0 }
 0x13c   :  { %v312_v9 = vsel %vm290_vm4, %v289_v8, 0.0 }
 0x13d   :  { %313 = vadd.xlane.f32.xlu1 %v312_v9 }
 0x17a   :  { %v293_v17 = vpop.xlane.xlu0 %292 }
 0x17b   :  { %v322_v18 = vmul.f32 %v891_v16, %v293_v17 }
 0x17d   :  { %v894_v19 = vsub.f32 %v282_v44, %v322_v18 }
 0x17f   :  { %v338_v20 = vmul.f32 %v894_v19, %v894_v19 }
 0x181   :  { %v346_v21 = vsel %vm290_vm4, %v338_v20, 0.0 }
 0x182   :  { %347 = vadd.xlane.f32.xlu2 %v346_v21  ;;  %v296_v22 = vpop.xlane.xlu0 %295 }
 0x183   :  { %v323_v23 = vmul.f32 %v891_v16, %v296_v22 }
 0x185   :  { %v900_v24 = vsub.f32 %v283_v48, %v323_v23 }
 0x187   :  { %v339_v25 = vmul.f32 %v900_v24, %v900_v24 }
 0x189   :  { %v349_v26 = vsel %vm290_vm4, %v339_v25, 0.0 }
 0x18a   :  { %v299_v27 = vpop.xlane.xlu1 %298  ;;  %350 = vadd.xlane.f32.xlu0 %v349_v26 }
 0x18b   :  { %v324_v28 = vmul.f32 %v891_v16, %v299_v27 }
 0x18d   :  { %v906_v29 = vsub.f32 %v284_v52, %v324_v28 }
 0x18f   :  { %v340_v30 = vmul.f32 %v906_v29, %v906_v29 }
 0x191   :  { %v352_v31 = vsel %vm290_vm4, %v340_v30, 0.0 }
 0x192   :  { %353 = vadd.xlane.f32.xlu1 %v352_v31  ;;  %v302_v32 = vpop.xlane.xlu1 %301 }
 0x193   :  { %v325_v33 = vmul.f32 %v891_v16, %v302_v32 }
 0x195   :  { %v912_v34 = vsub.f32 %v285_v56, %v325_v33 }
 0x197   :  { %v341_v35 = vmul.f32 %v912_v34, %v912_v34 }
 0x198   :  { %v305_v36 = vpop.xlane.xlu2 %304 }
 0x199   :  { %v326_v37 = vmul.f32 %v891_v16, %v305_v36  ;;  %v355_v38 = vsel %vm290_vm4, %v341_v35, 0.0 }
 0x19a   :  { %356 = vadd.xlane.f32.xlu2 %v355_v38 }
 0x19b   :  { %v918_v39 = vsub.f32 %v286_v60, %v326_v37 }
 0x19d   :  { %v342_v40 = vmul.f32 %v918_v39, %v918_v39 }
 0x19f   :  { %v358_v41 = vsel %vm290_vm4, %v342_v40, 0.0 }
 0x1a0   :  { %v308_v42 = vpop.xlane.xlu2 %307  ;;  %359 = vadd.xlane.f32.xlu0 %v358_v41 }
 0x1a1   :  { %v327_v43 = vmul.f32 %v891_v16, %v308_v42 }
 0x1a3   :  { %v924_v44 = vsub.f32 %v287_v0, %v327_v43 }
 0x1a5   :  { %v343_v45 = vmul.f32 %v924_v44, %v924_v44 }
 0x1a7   :  { %v361_v46 = vsel %vm290_vm4, %v343_v45, 0.0 }
 0x1a8   :  { %362 = vadd.xlane.f32.xlu1 %v361_v46  ;;  %v311_v47 = vpop.xlane.xlu0 %310 }
 0x1a9   :  { %v328_v48 = vmul.f32 %v891_v16, %v311_v47 }
 0x1ab   :  { %v930_v49 = vsub.f32 %v288_v4, %v328_v48 }
 0x1ad   :  { %v344_v50 = vmul.f32 %v930_v49, %v930_v49 }
 0x1af   :  { %v364_v51 = vsel %vm290_vm4, %v344_v50, 0.0 }
 0x1b0   :  { %v314_v52 = vpop.xlane.xlu1 %313  ;;  %365 = vadd.xlane.f32.xlu2 %v364_v51 }
 0x1b1   :  { %v329_v53 = vmul.f32 %v891_v16, %v314_v52 }
 0x1b3   :  { %v936_v54 = vsub.f32 %v289_v8, %v329_v53 }
 0x1b5   :  { %v345_v55 = vmul.f32 %v936_v54, %v936_v54 }
 0x1b7   :  { %v367_v56 = vsel %vm290_vm4, %v345_v55, 0.0 }
 0x1b8   :  { %368 = vadd.xlane.f32.xlu0 %v367_v56 }
 0x1f5   :  { %v348_v57 = vpop.xlane.xlu2 %347 }
 0x1f6   :  { %v370_v58 = vmul.f32 %v348_v57, %v891_v16 }
 0x1f8   :  { %v378_v61 = vadd.f32 1e-05, %v370_v58  ;;  %v980_v58 = vld [vmem:[%s1076_s4] ss:$0 sm:$0xff] }
 0x1fa   :  { %703 = vrsqrt.f32 %v378_v61  ;;  %vm392_vm8 = vweird.f32 %v378_v61 }
 0x1fd   :  { %v351_v59 = vpop.xlane.xlu0 %350 }
 0x1fe   :  { %v371_v60 = vmul.f32 %v351_v59, %v891_v16 }
 0x200   :  { %v379_v62 = vadd.f32 1e-05, %v371_v60  ;;  %v944_v2 = vpop.eup %703 }
 0x201   :  { %v387_v5 = vmul.f32 %v944_v2, %v378_v61  ;;  %vm393_vm6 = vweird.f32 %v944_v2 }
 0x202   :  { %705 = vrsqrt.f32 %v379_v62  ;;  %vm962_vm10 = vmor %vm392_vm8, %vm393_vm6  ;;  %vm402_vm11 = vweird.f32 %v379_v62 }
 0x203   :  { %v388_v11 = vmul.f32 %v944_v2, %v387_v5 }
 0x205   :  { %v354_v63 = vpop.xlane.xlu1 %353  ;;  %v389_v17 = vmul.f32 0.5, %v388_v11 }
 0x206   :  { %v372_v0 = vmul.f32 %v354_v63, %v891_v16 }
 0x207   :  { %v390_v25 = vsub.f32 1.5, %v389_v17 }
 0x208   :  { %v380_v1 = vadd.f32 1e-05, %v372_v0  ;;  %v946_v3 = vpop.eup %705 }
 0x209   :  { %v397_v7 = vmul.f32 %v946_v3, %v379_v62  ;;  %v391_v35 = vmul.f32 %v944_v2, %v390_v25  ;;  %vm403_vm7 = vweird.f32 %v946_v3 }
 0x20a   :  { %707 = vrsqrt.f32 %v380_v1  ;;  %vm966_vm13 = vmor %vm402_vm11, %vm403_vm7  ;;  %vm412_vm14 = vweird.f32 %v380_v1 }
 0x20b   :  { %v398_v12 = vmul.f32 %v946_v3, %v397_v7  ;;  %v395_v47 = vsel %vm962_vm10, %v944_v2, %v391_v35 }
 0x20c   :  { %v466_v59 = vmul.f32 %v395_v47, %v894_v19  ;;  %v576_v19 = vld [vmem:[%s1078_s6 + $0x38] sm:$0xff] }
 0x20d   :  { %v357_v4 = vpop.xlane.xlu2 %356  ;;  %v399_v20 = vmul.f32 0.5, %v398_v12  ;;  %613 = vmatpush.msrb.mxu1 %v576_v19 }
 0x20e   :  { %v373_v6 = vmul.f32 %v357_v4, %v891_v16 }
 0x20f   :  { %v400_v26 = vsub.f32 1.5, %v399_v20 }
 0x210   :  { %v708_v8 = vpop.eup %707  ;;  %v381_v9 = vadd.f32 1e-05, %v373_v6 }
 0x211   :  { %v407_v10 = vmul.f32 %v708_v8, %v380_v1  ;;  %v401_v37 = vmul.f32 %v946_v3, %v400_v26  ;;  %vm413_vm9 = vweird.f32 %v708_v8 }
 0x212   :  { %709 = vrsqrt.f32 %v381_v9  ;;  %vm414_vm15 = vmor %vm412_vm14, %vm413_vm9  ;;  %vm422_vm0 = vweird.f32 %v381_v9 }
 0x213   :  { %v360_v13 = vpop.xlane.xlu0 %359  ;;  %v408_v14 = vmul.f32 %v708_v8, %v407_v10  ;;  %v405_v48 = vsel %vm966_vm13, %v946_v3, %v401_v37  ;;  %v570_v37 = vld [vmem:[%s1078_s6 + $0x8] sm:$0xff] }
 0x214   :  { %v374_v15 = vmul.f32 %v360_v13, %v891_v16  ;;  %v467_v60 = vmul.f32 %v405_v48, %v900_v24  ;;  %v575_v24 = vld [vmem:[%s1078_s6 + $0x30] sm:$0xff] }
 0x215   :  { %v409_v22 = vmul.f32 0.5, %v408_v14  ;;  %614 = vmatpush.msrb.mxu1 %v575_v24 }
 0x216   :  { %v382_v18 = vadd.f32 1e-05, %v374_v15  ;;  %v479_v4 = vmul.f32 %v980_v58, %v467_v60 }
 0x217   :  { %v410_v30 = vsub.f32 1.5, %v409_v22  ;;  %v572_v22 = vld [vmem:[%s1078_s6 + $0x18] sm:$0xff] }
 0x218   :  { %v710_v21 = vpop.eup %709  ;;  %711 = vrsqrt.f32 %v382_v18  ;;  %vm432_vm3 = vweird.f32 %v382_v18 }
 0x219   :  { %v417_v23 = vmul.f32 %v710_v21, %v381_v9  ;;  %v411_v41 = vmul.f32 %v708_v8, %v410_v30  ;;  %vm423_vm12 = vweird.f32 %v710_v21  ;;  %v574_v9 = vld [vmem:[%s1078_s6 + $0x28] sm:$0xff] }
 0x21a   :  { %vm424_vm1 = vmor %vm422_vm0, %vm423_vm12  ;;  %615 = vmatpush.msrb.mxu1 %v574_v9  ;;  %vm589_vm0 = vcmask 1041409  }
 0x21b   :  { %v418_v27 = vmul.f32 %v710_v21, %v417_v23  ;;  %v363_v28 = vpop.xlane.xlu1 %362  ;;  %v415_v52 = vsel %vm414_vm15, %v708_v8, %v411_v41 }
 0x21c   :  { %v375_v31 = vmul.f32 %v363_v28, %v891_v16  ;;  %v468_v62 = vmul.f32 %v415_v52, %v906_v29  ;;  %v999_v29 = vld [vmem:[%s1077_s5] ss:$0 sm:$0xff]  ;;  %v571_v28 = vld [vmem:[%s1078_s6 + $0x10] sm:$0xff] }
 0x21d   :  { %v419_v32 = vmul.f32 0.5, %v418_v27  ;;  %v491_v17 = vadd.f32 %v999_v29, %v479_v4 }
 0x21e   :  { %v712_v33 = vpop.eup %711  ;;  %v957_v36 = vadd.f32 1e-05, %v375_v31  ;;  %v480_v6 = vmul.f32 %v980_v58, %v468_v62 }
 0x21f   :  { %v420_v38 = vsub.f32 1.5, %v419_v32  ;;  %v427_v40 = vmul.f32 %v712_v33, %v382_v18  ;;  %vm433_vm2 = vweird.f32 %v712_v33  ;;  %v505_v30 = vsel %vm290_vm4, %v491_v17, 0.0 }
 0x220   :  { %713 = vrsqrt.f32 %v957_v36  ;;  %vm434_vm5 = vmor %vm432_vm3, %vm433_vm2  ;;  %v492_v20 = vadd.f32 %v999_v29, %v480_v6  ;;  %vm442_vm7 = vweird.f32 %v957_v36  ;;  %v748_v32 = vmov 8.0  }
 0x221   :  { %v421_v43 = vmul.f32 %v710_v21, %v420_v38  ;;  %v428_v45 = vmul.f32 %v712_v33, %v427_v40  ;;  %v506_v41 = vrot.slane %v505_v30, 4  ;;  %vm593_vm2 = vcmask 1043459  }
 0x222   :  { %v512_v35 = vsel %vm290_vm4, %v492_v20, 0.0  ;;  %vm595_vm3 = vcmask 1044484  }
 0x223   :  { %v429_v50 = vmul.f32 0.5, %v428_v45  ;;  %v366_v51 = vpop.xlane.xlu2 %365  ;;  %v425_v55 = vsel %vm424_vm1, %v710_v21, %v421_v43  ;;  %v569_v43 = vld [vmem:[%s1078_s6] sm:$0xff]  ;;  %v513_v47 = vrot.slane %v512_v35, 4  ;;  %v507_v60 = vadd.f32 %v506_v41, %v505_v30 }
 0x224   :  { %v376_v53 = vmul.f32 %v366_v51, %v891_v16  ;;  %v469_v1 = vmul.f32 %v425_v55, %v912_v34  ;;  %v478_v34 = vmul.f32 %v980_v58, %v466_v59  ;;  %vm591_vm1 = vcmask 1042434  }
 0x225   :  { %v430_v56 = vsub.f32 1.5, %v429_v50 }
 0x226   :  { %v714_v57 = vpop.eup %713  ;;  %v984_v61 = vadd.f32 1e-05, %v376_v53  ;;  %v481_v10 = vmul.f32 %v980_v58, %v469_v1  ;;  %v490_v15 = vadd.f32 %v999_v29, %v478_v34 }
 0x227   :  { %v431_v63 = vmul.f32 %v712_v33, %v430_v56  ;;  %v437_v0 = vmul.f32 %v714_v57, %v957_v36  ;;  %vm443_vm6 = vweird.f32 %v714_v57  ;;  %v627_v56 = vld [vmem:[%s1080_s8 + $0x8] sm:$0xff] }
 0x228   :  { %715 = vrsqrt.f32 %v984_v61  ;;  %v493_v23 = vadd.f32 %v999_v29, %v481_v10  ;;  %vm444_vm8 = vmor %vm442_vm7, %vm443_vm6  ;;  %vm452_vm10 = vweird.f32 %v984_v61  ;;  %650 = vmatpush.msra.mxu2 %v627_v56  ;;  %vm599_vm6 = vcmask 1046534  }
 0x229   :  { %v435_v2 = vsel %vm434_vm5, %v712_v33, %v431_v63  ;;  %v438_v3 = vmul.f32 %v714_v57, %v437_v0  ;;  %v498_v33 = vsel %vm290_vm4, %v490_v15, 0.0  ;;  %v514_v0 = vadd.f32 %v513_v47, %v512_v35 }
 0x22a   :  { %v470_v5 = vmul.f32 %v435_v2, %v918_v39  ;;  %v573_v39 = vld [vmem:[%s1078_s6 + $0x20] sm:$0xff]  ;;  %v519_v38 = vsel %vm290_vm4, %v493_v23, 0.0  ;;  %v499_v46 = vrot.slane %v498_v33, 4  ;;  %vm597_vm5 = vcmask 1045509  }
 0x22b   :  { %v439_v7 = vmul.f32 0.5, %v438_v3  ;;  %v369_v8 = vpop.xlane.xlu0 %368  ;;  %616 = vmatpush.msrb.mxu1 %v573_v39  ;;  %v520_v50 = vrot.slane %v519_v38, 4  ;;  %vm601_vm7 = vcmask 1047559  }
 0x22c   :  { %v377_v11 = vmul.f32 %v369_v8, %v891_v16  ;;  %v482_v12 = vmul.f32 %v980_v58, %v470_v5  ;;  %v500_v2 = vadd.f32 %v499_v46, %v498_v33  ;;  %v508_v5 = vrot.slane %v507_v60, 2 }
 0x22d   :  { %v440_v13 = vsub.f32 1.5, %v439_v7  ;;  %617 = vmatpush.msrb.mxu1 %v572_v22  ;;  %v521_v3 = vadd.f32 %v520_v50, %v519_v38  ;;  %v515_v8 = vrot.slane %v514_v0, 2 }
 0x22e   :  { %v716_v14 = vpop.eup %715  ;;  %v1016_v18 = vadd.f32 1e-05, %v377_v11  ;;  %v494_v25 = vadd.f32 %v999_v29, %v482_v12  ;;  %v501_v10 = vrot.slane %v500_v2, 2 }
 0x22f   :  { %v441_v16 = vmul.f32 %v714_v57, %v440_v13  ;;  %v447_v21 = vmul.f32 %v716_v14, %v984_v61  ;;  %618 = vmatpush.msrb.mxu1 %v571_v28  ;;  %vm453_vm9 = vweird.f32 %v716_v14  ;;  %v522_v11 = vrot.slane %v521_v3, 2 }
 0x230   :  { %717 = vrsqrt.f32 %v1016_v18  ;;  %vm454_vm11 = vmor %vm452_vm10, %vm453_vm9  ;;  %vm462_vm13 = vweird.f32 %v1016_v18  ;;  %v502_v22 = vadd.f32 %v501_v10, %v500_v2  ;;  %v700_v10 = vld [vmem:[%s1081_s9] ss:$0 sm:$0xff] }
 0x231   :  { %v445_v26 = vsel %vm444_vm8, %v714_v57, %v441_v16  ;;  %v448_v27 = vmul.f32 %v716_v14, %v447_v21  ;;  %719 = vrcp.f32 %v748_v32  ;;  %619 = vmatpush.msrb.mxu1 %v570_v37  ;;  %v626_v57 = vld [vmem:[%s1080_s8] sm:$0xff]  ;;  %v516_v16 = vadd.f32 %v515_v8, %v514_v0 }
 0x232   :  { %v471_v31 = vmul.f32 %v445_v26, %v924_v44  ;;  %v526_v44 = vsel %vm290_vm4, %v494_v25, 0.0  ;;  %651 = vmatpush.msra.mxu2 %v626_v57  ;;  %v523_v23 = vadd.f32 %v522_v11, %v521_v3  ;;  %v503_v35 = vrot.slane %v502_v22, 1 }
 0x233   :  { %v449_v36 = vmul.f32 0.5, %v448_v27  ;;  %v527_v53 = vrot.slane %v526_v44, 4  ;;  %620 = vmatpush.msrb.mxu1 %v569_v43  ;;  %v517_v32 = vrot.slane %v516_v16, 1  ;;  %vm632_vm8 = vcmask 130048  }
 0x234   :  { %v483_v40 = vmul.f32 %v980_v58, %v471_v31 }
 0x235   :  { %v450_v42 = vsub.f32 1.5, %v449_v36  ;;  %v528_v34 = vadd.f32 %v527_v53, %v526_v44  ;;  %v524_v36 = vrot.slane %v523_v23, 1  ;;  %v518_v43 = vadd.f32 %v517_v32, %v516_v16 }
 0x236   :  { %v718_v45 = vpop.eup %717  ;;  %v495_v48 = vadd.f32 %v999_v29, %v483_v40 }
 0x237   :  { %v451_v51 = vmul.f32 %v716_v14, %v450_v42  ;;  %v457_v52 = vmul.f32 %v718_v45, %v1016_v18  ;;  %v720_v59 = vpop.eup %719  ;;  %vm463_vm12 = vweird.f32 %v718_v45  ;;  %v529_v13 = vrot.slane %v528_v34, 2 }
 0x238   :  { %v533_v55 = vsel %vm290_vm4, %v495_v48, 0.0  ;;  %v555_v24 = vmul.f32 8.0, %v720_v59  ;;  %vm464_vm14 = vmor %vm462_vm13, %vm463_vm12  ;;  %vm559_vm15 = vweird.f32 %v720_v59  ;;  %v525_v46 = vadd.f32 %v524_v36, %v523_v23 }
 0x239   :  { %v534_v62 = vrot.slane %v533_v55, 4  ;;  %v455_v63 = vsel %vm454_vm11, %v716_v14, %v451_v51  ;;  %v458_v61 = vmul.f32 %v718_v45, %v457_v52  ;;  %v509_v14 = vadd.f32 %v508_v5, %v507_v60 }
 0x23a   :  { %v472_v1 = vmul.f32 %v455_v63, %v930_v49  ;;  %v556_v49 = vsub.f32 1.0, %v555_v24  ;;  %v530_v27 = vadd.f32 %v529_v13, %v528_v34 }
 0x23b   :  { %v459_v19 = vmul.f32 0.5, %v458_v61  ;;  %v535_v6 = vadd.f32 %v534_v62, %v533_v55  ;;  %v510_v18 = vrot.slane %v509_v14, 1 }
 0x23c   :  { %v484_v4 = vmul.f32 %v980_v58, %v472_v1  ;;  %v557_v26 = vmul.f32 %v720_v59, %v556_v49  ;;  %v531_v40 = vrot.slane %v530_v27, 1 }
 0x23d   :  { %v460_v7 = vsub.f32 1.5, %v459_v19  ;;  %v536_v15 = vrot.slane %v535_v6, 2  ;;  %v511_v41 = vadd.f32 %v510_v18, %v509_v14 }
 0x23e   :  { %v496_v9 = vadd.f32 %v999_v29, %v484_v4  ;;  %v558_v38 = vadd.f32 %v720_v59, %v557_v26  ;;  %v532_v50 = vadd.f32 %v531_v40, %v530_v27 }
 0x23f   :  { %v461_v12 = vmul.f32 %v718_v45, %v460_v7  ;;  %v537_v30 = vadd.f32 %v536_v15, %v535_v6  ;;  %v699_v6 = vld [vmem:[%s1079_s7] ss:$0 sm:$0xff] }
 0x240   :  { %v540_v39 = vsel %vm290_vm4, %v496_v9, 0.0  ;;  %v560_v48 = vsel %vm559_vm15, %v720_v59, %v558_v38 }
 0x241   :  { %v541_v17 = vrot.slane %v540_v39, 4  ;;  %v465_v20 = vsel %vm464_vm14, %v718_v45, %v461_v12  ;;  %v538_v42 = vrot.slane %v537_v30, 1  ;;  %v562_v51 = vmul.f32 %v560_v48, %v511_v41 }
 0x242   :  { %v473_v21 = vmul.f32 %v465_v20, %v936_v54  ;;  %v563_v55 = vmul.f32 %v560_v48, %v518_v43  ;;  %v564_v60 = vmul.f32 %v560_v48, %v525_v46  ;;  %v565_v62 = vmul.f32 %v560_v48, %v532_v50 }
 0x243   :  { %v542_v25 = vadd.f32 %v541_v17, %v540_v39 }
 0x244   :  { %v485_v28 = vmul.f32 %v980_v58, %v473_v21  ;;  %v504_v58 = vadd.f32 %v503_v35, %v502_v22 }
 0x245   :  { %v543_v31 = vrot.slane %v542_v25, 2 }
 0x246   :  { %v497_v33 = vadd.f32 %v999_v29, %v485_v28  ;;  %v539_v29 = vadd.f32 %v538_v42, %v537_v30  ;;  %v561_v56 = vmul.f32 %v560_v48, %v504_v58 }
 0x247   :  { %v544_v37 = vadd.f32 %v543_v31, %v542_v25 }
 0x248   :  { %v547_v54 = vsel %vm290_vm4, %v497_v33, 0.0  ;;  %v566_v61 = vmul.f32 %v560_v48, %v539_v29  ;;  %v590_v0 = vsel %vm589_vm0, %v562_v51, %v561_v56 }
 0x249   :  { %v548_v44 = vrot.slane %v547_v54, 4  ;;  %v545_v45 = vrot.slane %v544_v37, 1  ;;  %v592_v2 = vsel %vm591_vm1, %v563_v55, %v590_v0 }
 0x24a   :  { %v594_v3 = vsel %vm593_vm2, %v564_v60, %v592_v2 }
 0x24b   :  { %v549_v47 = vadd.f32 %v548_v44, %v547_v54  ;;  %v546_v53 = vadd.f32 %v545_v45, %v544_v37  ;;  %v596_v19 = vsel %vm595_vm3, %v565_v62, %v594_v3 }
 0x24c   :  { %v598_v34 = vsel %vm597_vm5, %v566_v61, %v596_v19 }
 0x24d   :  { %v550_v52 = vrot.slane %v549_v47, 2  ;;  %v567_v1 = vmul.f32 %v560_v48, %v546_v53 }
 0x24f   :  { %v551_v57 = vadd.f32 %v550_v52, %v549_v47  ;;  %v600_v4 = vsel %vm599_vm6, %v567_v1, %v598_v34 }
 0x251   :  { %v552_v63 = vrot.slane %v551_v57, 1 }
 0x253   :  { %v553_v59 = vadd.f32 %v552_v63, %v551_v57 }
 0x255   :  { %v568_v24 = vmul.f32 %v560_v48, %v553_v59 }
 0x257   :  { %v602_v5 = vsel %vm601_vm7, %v568_v24, %v600_v4 }
 0x258   :  { %690 = vmatmul.msk.f32.vlgmr.msrb.gmra.mxu1 %vm290_vm4, %v602_v5 }
 0x2d5   :  { %v622_v7 = vpop.f32.mrf.mxu1 }
 0x2d6   :  { %v623_v8 = vadd.f32 %v699_v6, %v622_v7 }
 0x2d8   :  { %v625_v9 = vmax.f32 %v623_v8, 0.0 }
 0x2da   :  { %691 = vmatmul.msk.f32.vlgmr.msra.gmra.mxu2 %vm632_vm8, %v625_v9 }
 0x35d   :  { %v653_v11 = vpop.f32.mrf.mxu2 }
 0x35e   :  { %v654_v12 = vadd.f32 %v700_v10, %v653_v11 }
 0x360   :  { %656 = vst [vmem:[#allocation2] sm:$0xff] %v654_v12 }
 0x361   :  { %667 = dma.vmem_to_hbm [thread:$0]  %s663_s26, 128, %s665_s28, [#allocation3]  }
 0x362   :  { %745 = dma.done.wait [#allocation3], 128  }
 0x363   :  { %746 = vsyncadd [#allocation3], 4294967168 }
 0x364   :  { %672 = vsyncpa [#allocation3], 1 }

</bundles_post_ra>
